<compile_context>
chip_gen: v6e
topology: v6e:2x2x1
jax: 0.10.0
libtpu: 0.0.40
codegen_flags: <defaults>
</compile_context>

<pallas_src>
import itertools
import math

import jax
import jax.numpy as jnp
from jax.experimental import pallas as pl
from jax.experimental.pallas import tpu as pltpu


# ---------------------------------------------------------------------------
# Pallas kernel: out = [relu]( (W @ X_col) * scale + bias (+ skip) )
#   W:     (Cout, K)        -- resident across the grid
#   X_col: (K, block_m)     -- lane-dense tile of the im2col matrix
#   scale/bias: (Cout, 1)   -- folded BatchNorm affine (per output channel)
#   skip:  (Cout, block_m)  -- optional residual tile
# ---------------------------------------------------------------------------
def _make_fused_matmul_kernel(apply_relu: bool, has_skip: bool):
    def kernel(w_ref, x_ref, scale_ref, bias_ref, *rest):
        if has_skip:
            skip_ref, o_ref = rest
        else:
            (o_ref,) = rest
        acc = jnp.dot(w_ref[...], x_ref[...],
                      preferred_element_type=jnp.float32)
        y = acc * scale_ref[...] + bias_ref[...]
        if has_skip:
            y = y + skip_ref[...].astype(jnp.float32)
        if apply_relu:
            y = jnp.maximum(y, 0.0)
        o_ref[...] = y.astype(o_ref.dtype)
    return kernel


def _fused_matmul(w, x_col, scale, bias, skip=None, relu=True, block_m=256):
    """Lane-tiled fused conv-as-matmul + BN affine (+ skip) (+ relu)."""
    co, k = w.shape
    k2, m = x_col.shape
    assert k == k2, (k, k2)

    m_pad = pl.cdiv(m, block_m) * block_m
    if m_pad != m:
        x_col = jnp.pad(x_col, ((0, 0), (0, m_pad - m)))
        if skip is not None:
            skip = jnp.pad(skip, ((0, 0), (0, m_pad - m)))

    in_specs = [
        pl.BlockSpec((co, k), lambda i: (0, 0)),        # weights (resident)
        pl.BlockSpec((k, block_m), lambda i: (0, i)),   # im2col tile
        pl.BlockSpec((co, 1), lambda i: (0, 0)),        # per-channel scale
        pl.BlockSpec((co, 1), lambda i: (0, 0)),        # per-channel bias
    ]
    args = [
        w.astype(jnp.float32),
        x_col.astype(jnp.float32),
        scale.reshape(co, 1).astype(jnp.float32),
        bias.reshape(co, 1).astype(jnp.float32),
    ]
    if skip is not None:
        in_specs.append(pl.BlockSpec((co, block_m), lambda i: (0, i)))
        args.append(skip.astype(jnp.float32))

    out = pl.pallas_call(
        _make_fused_matmul_kernel(relu, skip is not None),
        out_shape=jax.ShapeDtypeStruct((co, m_pad), jnp.float32),
        grid=(m_pad // block_m,),
        in_specs=in_specs,
        out_specs=pl.BlockSpec((co, block_m), lambda i: (0, i)),
        compiler_params=pltpu.CompilerParams(
            dimension_semantics=("parallel",)),
    )(*args)
    return out[:, :m]


# ---------------------------------------------------------------------------
# Wrapper-side layout plumbing (pure JAX, no compute): im2col and col->NCHW.
# ---------------------------------------------------------------------------
def _im2col(x, kernel_size, stride, padding):
    """x: (N, C, *spatial) -> (C*k^nd, N*prod(out_spatial)), out_spatial."""
    n, c = x.shape[:2]
    spatial = x.shape[2:]
    nd = len(spatial)
    ks, st, pd = (kernel_size,) * nd, (stride,) * nd, (padding,) * nd
    out_spatial = tuple(
        (spatial[d] + 2 * pd[d] - ks[d]) // st[d] + 1 for d in range(nd))

    x_pad = jnp.pad(
        x, ((0, 0), (0, 0)) + tuple((pd[d], pd[d]) for d in range(nd)))

    taps = []
    for offs in itertools.product(*(range(k) for k in ks)):
        sl = tuple(
            slice(offs[d], offs[d] + st[d] * (out_spatial[d] - 1) + 1, st[d])
            for d in range(nd))
        taps.append(x_pad[(slice(None), slice(None)) + sl])

    patches = jnp.stack(taps, axis=2)                 # (n, c, T, *out_spatial)
    perm = (1, 2, 0) + tuple(range(3, 3 + nd))        # -> (c, T, n, *out_spatial)
    x_col = jnp.transpose(patches, perm).reshape(
        c * len(taps), n * math.prod(out_spatial))
    return x_col, out_spatial


def _col_to_nchw(y_col, n, out_spatial):
    co = y_col.shape[0]
    y = y_col.reshape((co, n) + tuple(out_spatial))
    return jnp.moveaxis(y, 1, 0)                      # (n, co, *out_spatial)


# ---------------------------------------------------------------------------
# ResidualBlock forward.
# ---------------------------------------------------------------------------
def residual_block_forward(x, params, *, strides=1, use_1x1_conv=False,
                           eps=1e-5, block_m=256):
    n = x.shape[0]
    nd = x.ndim - 2
    w1, w2 = params["w1"], params["w2"]
    c_out = w1.shape[0]

    # Fold BatchNorm (inference mode) into per-channel scale/bias.
    scale1 = params["gamma1"] / jnp.sqrt(params["var1"] + eps)
    bias1 = params["beta1"] - params["mean1"] * scale1
    scale2 = params["gamma2"] / jnp.sqrt(params["var2"] + eps)
    bias2 = params["beta2"] - params["mean2"] * scale2

    # conv1 (3^nd, pad=1, stride=s) + bn1 + relu  -- one fused Pallas call.
    x1_col, out_sp = _im2col(x, 3, strides, 1)
    y1_col = _fused_matmul(w1.reshape(c_out, -1), x1_col, scale1, bias1,
                           relu=True, block_m=block_m)

    # Skip path.
    if use_1x1_conv:
        w3, b3 = params["w3"], params["b3"]
        strided = x[(slice(None), slice(None)) +
                    (slice(None, None, strides),) * nd]
        xs_col = jnp.moveaxis(strided, 1, 0).reshape(x.shape[1], -1)
        skip_col = _fused_matmul(w3.reshape(c_out, -1), xs_col,
                                 jnp.ones((c_out,), jnp.float32), b3,
                                 relu=False, block_m=block_m)
    else:
        skip_col = jnp.moveaxis(x, 1, 0).reshape(x.shape[1], -1)

    # conv2 (3^nd, pad=1, stride=1) + bn2 + residual add + relu -- fused.
    y1 = _col_to_nchw(y1_col, n, out_sp)
    x2_col, out_sp2 = _im2col(y1, 3, 1, 1)
    out_col = _fused_matmul(w2.reshape(c_out, -1), x2_col, scale2, bias2,
                            skip=skip_col, relu=True, block_m=block_m)
    return _col_to_nchw(out_col, n, out_sp2)


# ---------------------------------------------------------------------------
# Pure-JAX reference (for in-script correctness check).
# ---------------------------------------------------------------------------
def _reference_forward(x, params, *, strides, use_1x1_conv, eps=1e-5):
    nd = x.ndim - 2

    def conv(v, w, stride, padding):
        return jax.lax.conv_general_dilated(
            v, w, window_strides=(stride,) * nd,
            padding=[(padding, padding)] * nd,
            precision=jax.lax.Precision.HIGHEST)

    def bn(y, g, b, m, v):
        shp = (1, -1) + (1,) * nd
        return (y - m.reshape(shp)) / jnp.sqrt(v.reshape(shp) + eps) \
               * g.reshape(shp) + b.reshape(shp)

    y = jax.nn.relu(bn(conv(x, params["w1"], strides, 1),
                       params["gamma1"], params["beta1"],
                       params["mean1"], params["var1"]))
    y = bn(conv(y, params["w2"], 1, 1),
           params["gamma2"], params["beta2"], params["mean2"], params["var2"])
    if use_1x1_conv:
        shp = (1, -1) + (1,) * nd
        skip = conv(x, params["w3"], strides, 0) + params["b3"].reshape(shp)
    else:
        skip = x
    return jax.nn.relu(y + skip)


if __name__ == "__main__":
    key = jax.random.PRNGKey(0)
    keys = jax.random.split(key, 13)

    # Small 2D config: batch=2, input_channels=4, num_channels=8, spatial=16x16.
    N, C_IN, C_OUT, H, W = 2, 4, 8, 16, 16
    STRIDES = 1
    USE_1X1 = True  # needed since C_IN != C_OUT

    x = jax.random.normal(keys[0], (N, C_IN, H, W), jnp.float32)

    b1 = jnp.sqrt(6.0 / (C_IN * 9))
    b2 = jnp.sqrt(6.0 / (C_OUT * 9))
    b3b = jnp.sqrt(1.0 / C_IN)
    params = dict(
        w1=jax.random.uniform(keys[1], (C_OUT, C_IN, 3, 3), jnp.float32, -b1, b1),
        w2=jax.random.uniform(keys[2], (C_OUT, C_OUT, 3, 3), jnp.float32, -b2, b2),
        w3=jax.random.uniform(keys[3], (C_OUT, C_IN, 1, 1), jnp.float32, -b3b, b3b),
        b3=jax.random.uniform(keys[4], (C_OUT,), jnp.float32, -0.1, 0.1),
        gamma1=jax.random.uniform(keys[5], (C_OUT,), jnp.float32, 0.5, 1.5),
        beta1=0.1 * jax.random.normal(keys[6], (C_OUT,), jnp.float32),
        mean1=0.1 * jax.random.normal(keys[7], (C_OUT,), jnp.float32),
        var1=jax.random.uniform(keys[8], (C_OUT,), jnp.float32, 0.5, 1.5),
        gamma2=jax.random.uniform(keys[9], (C_OUT,), jnp.float32, 0.5, 1.5),
        beta2=0.1 * jax.random.normal(keys[10], (C_OUT,), jnp.float32),
        mean2=0.1 * jax.random.normal(keys[11], (C_OUT,), jnp.float32),
        var2=jax.random.uniform(keys[12], (C_OUT,), jnp.float32, 0.5, 1.5),
    )

    out = residual_block_forward(x, params, strides=STRIDES,
                                 use_1x1_conv=USE_1X1)
    out = jax.block_until_ready(out)

    ref = _reference_forward(x, params, strides=STRIDES, use_1x1_conv=USE_1X1)
    assert out.shape == ref.shape, (out.shape, ref.shape)
    assert jnp.allclose(out, ref, rtol=5e-3, atol=5e-3), \
        float(jnp.max(jnp.abs(out - ref)))

    print("KERNEL_OK")
</pallas_src>

<mosaic_0001>
module attributes {stable_mosaic.version = 11 : i64} {
  func.func @kernel(%arg0: i32, %arg1: memref<8x36xf32, #tpu.memory_space<vmem>>, %arg2: memref<36x256xf32, #tpu.memory_space<vmem>>, %arg3: memref<8x1xf32, #tpu.memory_space<vmem>>, %arg4: memref<8x1xf32, #tpu.memory_space<vmem>>, %arg5: memref<8x256xf32, #tpu.memory_space<vmem>>) attributes {dimension_semantics = [#tpu.dimension_semantics<parallel>], iteration_bounds = array<i64: 2>, scalar_prefetch = 0 : i64, scratch_operands = 0 : i64, tpu.core_type = #tpu.core_type<tc>, window_params = [{pipeline_mode = #tpu.pipeline_mode<synchronous>, transform_indices = @transform_0, window_bounds = array<i64: 8, 36>}, {transform_indices = @transform_1, window_bounds = array<i64: 36, 256>}, {pipeline_mode = #tpu.pipeline_mode<synchronous>, transform_indices = @transform_2, window_bounds = array<i64: 8, 1>}, {pipeline_mode = #tpu.pipeline_mode<synchronous>, transform_indices = @transform_3, window_bounds = array<i64: 8, 1>}, {transform_indices = @transform_4, window_bounds = array<i64: 8, 256>}]} {
    %c0 = arith.constant 0 : index
    %c0_0 = arith.constant 0 : index
    %0 = vector.load %arg1[%c0, %c0_0] : memref<8x36xf32, #tpu.memory_space<vmem>>, vector<8x36xf32>
    %c0_1 = arith.constant 0 : index
    %c0_2 = arith.constant 0 : index
    %1 = vector.load %arg2[%c0_1, %c0_2] : memref<36x256xf32, #tpu.memory_space<vmem>>, vector<36x256xf32>
    %cst = arith.constant dense<0.000000e+00> : vector<8x256xf32>
    %2 = tpu.matmul %0, %1, %cst {dimension_numbers = #tpu.dot_dimension_numbers<[1], [0], [0], [1], [0, 0, 1, 1], [], []>} : vector<8x36xf32>, vector<36x256xf32>, vector<8x256xf32> -> vector<8x256xf32>
    %c0_3 = arith.constant 0 : index
    %c0_4 = arith.constant 0 : index
    %3 = vector.load %arg3[%c0_3, %c0_4] : memref<8x1xf32, #tpu.memory_space<vmem>>, vector<8x1xf32>
    %4 = vector.broadcast %3 : vector<8x1xf32> to vector<8x256xf32>
    %5 = arith.mulf %2, %4 : vector<8x256xf32>
    %c0_5 = arith.constant 0 : index
    %c0_6 = arith.constant 0 : index
    %6 = vector.load %arg4[%c0_5, %c0_6] : memref<8x1xf32, #tpu.memory_space<vmem>>, vector<8x1xf32>
    %7 = vector.broadcast %6 : vector<8x1xf32> to vector<8x256xf32>
    %8 = arith.addf %5, %7 : vector<8x256xf32>
    %cst_7 = arith.constant 0.000000e+00 : f32
    %9 = vector.broadcast %cst_7 : f32 to vector<8x256xf32>
    %10 = arith.maximumf %8, %9 : vector<8x256xf32>
    %c0_8 = arith.constant 0 : index
    %c0_9 = arith.constant 0 : index
    %11 = vector.load %arg5[%c0_8, %c0_9] : memref<8x256xf32, #tpu.memory_space<vmem>>, vector<8x256xf32>
    tpu.vector_store %arg5[%c0_8, %c0_9], %10 {strides = array<i32>} : memref<8x256xf32, #tpu.memory_space<vmem>>, vector<8x256xf32>,
    return
  }
  func.func @transform_0(%arg0: i32) -> (i32, i32) {
    %c0_i32 = arith.constant 0 : i32
    %c0_i32_0 = arith.constant 0 : i32
    %c0_i32_1 = arith.constant 0 : i32
    return %c0_i32, %c0_i32_0 : i32, i32
  }
  func.func @transform_1(%arg0: i32) -> (i32, i32) {
    %c0_i32 = arith.constant 0 : i32
    %c0_i32_0 = arith.constant 0 : i32
    return %c0_i32, %arg0 : i32, i32
  }
  func.func @transform_2(%arg0: i32) -> (i32, i32) {
    %c0_i32 = arith.constant 0 : i32
    %c0_i32_0 = arith.constant 0 : i32
    %c0_i32_1 = arith.constant 0 : i32
    return %c0_i32, %c0_i32_0 : i32, i32
  }
  func.func @transform_3(%arg0: i32) -> (i32, i32) {
    %c0_i32 = arith.constant 0 : i32
    %c0_i32_0 = arith.constant 0 : i32
    %c0_i32_1 = arith.constant 0 : i32
    return %c0_i32, %c0_i32_0 : i32, i32
  }
  func.func @transform_4(%arg0: i32) -> (i32, i32) {
    %c0_i32 = arith.constant 0 : i32
    %c0_i32_0 = arith.constant 0 : i32
    return %c0_i32, %arg0 : i32, i32
  }
}

</mosaic_0001>

<bundles_post_ra>
// kernel: tpu_custom_call.1
= control target key start
LH: loop header
LB: loop body
LE: loop exit
PB: predicated region body
PF: predicated region fallthrough
CT: control target
= control target key end

     0   :  { %9 = vsyncpa [#allocation3], 0  ;;  %s759_s0 = inlined_call_operand.vmem [shape: f32[8,36], index: 0, kind: input, shape index: {}]   ;;  %s760_s1 = inlined_call_operand.hbm [shape: f32[36,512], index: 1, kind: input, shape index: {}]   ;;  %s761_s2 = inlined_call_operand.vmem [shape: f32[8,1], index: 2, kind: input, shape index: {}]   ;;  %s762_s3 = inlined_call_operand.vmem [shape: f32[8,1], index: 3, kind: input, shape index: {}]   ;;  %s763_s4 = inlined_call_operand.hbm [shape: f32[8,512], index: 4, kind: output, shape index: {}]  }
   0x1   :  { %11 = vsyncpa [#allocation3 + $0x1], 0 }
   0x2   :  { %12 = vsyncpa [#allocation4], 0 }
   0x3   :  { %14 = vsyncpa [#allocation4 + $0x1], 0  ;;  %s613_s15 = smov 0   ;;  %s615_s16 = smov 0  }
   0x4   :  { %s617_s17 = smov 0   ;;  %s619_s18 = smov 0  }
   0x5 LB: > { %s634_s19 = sadd.s32 4294967295, %s579_s18   ;;  %s416_s20 = sadd.s32 4294967294, %s579_s18   ;;  %s579_s18 = sphi %s619_s18, %s778_s18   ;;  %s575_s17 = sphi %s617_s17, %s777_s17   ;;  %s571_s16 = sphi %s615_s16, %s776_s16   ;;  %s567_s15 = sphi %s613_s15, %s775_s15  }
   0x6   : > { %s638_s21 = sadd.s32 1, %s579_s18   ;;  %s48_s22 = sadd.s32 1, %s575_s17 }
   0x7   : > { %s45_s23 = ssub.s32 %s579_s18, %s638_s21  ;;  %p55_p0 = scmp.ne.s32.totalorder %s575_s17, %s571_s16 }
   0x8   : > { %p46_p1 = scmp.eq.s32.totalorder %s45_s23, 0  ;;  %p56_p2 = scmp.eq.s32.totalorder %s579_s18, 0 }
   0x9   : > { %p61_p3 = scmp.ne.s32.totalorder %s571_s16, %s567_s15  ;;  %p62_p4 = scmp.eq.s32.totalorder %s634_s19, 0 }
   0xa   : > { %s650_s24 = scalar_select %p46_p1, %s575_s17, %s48_s22  }
   0xb   : > { %p57_p5 = por %p56_p2, %p55_p0  ;;  %p652_p6 = por %p62_p4, %p61_p3 }
   0xc   : > { %p127_p7 = scmp.eq.s32.totalorder %s634_s19, 1  ;;  %p133_p8 = scmp.eq.s32.totalorder %s416_s20, 1 }
   0xd   : > { %s766_s25 = scalar_select %p652_p6, 1, 0 }
   0xe   : > { %p447_p10 = scmp.lt.s32.totalorder %s579_s18, 2  ;;  %p659_p11 = por %p127_p7, %p55_p0 }
   0xf   : > { %p663_p12 = por %p133_p8, %p61_p3  ;;  %s162_s28 = sand.u32 1, %s575_s17  }
  0x10   : > { %s767_s26 = scalar_select %p659_p11, 1, 0 }
  0x11   : > { %s768_s27 = scalar_select %p663_p12, 1, 0 }
  0x12   : > { %s431_s29 = sshll.u32 %s579_s18, 8  ;;  %s433_s30 = smul.u32 80, %s162_s28 }
  0x13   : > { %s672_s7 = scalar_lea.hbm %s760_s1, %s431_s29  ;;  %p674_p13 = pnand %p447_p10, %p57_p5 }
  0x14   : > { %s166_s9 = scalar_lea.vmem [#allocation2], %s433_s30  ;;  %s681_s11 = scalar_lea.sflag [#allocation3], %s162_s28 }
  0x15   : > { %s173_s10 = sshll.u32 %s166_s9, 4  ;;  %s487_s12 = scalar_lea.hbm %s672_s7, 1280  ;;  %s678_s10 = int_to_ptr.vmem [resolvable:$true] %s173_s10 }
  0x16   : > { %p488_p1 = scmp.ne.s32.totalorder %s672_s7, %s487_s12  ;;  %p489_p2 = pneg %p674_p13 }
  0x17   : > { %s492_s20 = scalar_lea.hbm %s760_s1, 2560  ;;  %p493_p5 = scmp.lt.s32.totalorder %s672_s7, %s760_s1 }
  0x18   : > { %p490_p3 = pnand %p489_p2, %p488_p1  ;;  %p494_p7 = scmp.lt.s32.totalorder %s492_s20, %s487_s12 }
  0x1a   : > { %p491_p4 = pneg %p490_p3  ;;  %p495_p8 = por %p494_p7, %p493_p5 }
  0x1c   : > { %p496_p10 = pnand %p495_p8, %p491_p4 }
  0x1e   : > { %499 = shalt.err (!%p496_p10)
}
  0x1f   : > { %s500_s28 = scalar_lea.vmem %s678_s10, 1280  ;;  %s581_s29 = smov [#allocation2]  }
  0x20   : > { %p501_p9 = scmp.ne.s32.totalorder %s678_s10, %s500_s28  ;;  %s505_s30 = sshll.u32 %s581_s29, 4  ;;  %s506_s30 = int_to_ptr.vmem [resolvable:$false] %s505_s30 }
  0x21   : > { %s507_s5 = scalar_lea.vmem %s506_s30, 2560  ;;  %p508_p3 = scmp.lt.s32.totalorder %s678_s10, %s506_s30 }
  0x22   : > { %p503_p0 = pnand %p501_p9, %p489_p2  ;;  %p509_p12 = scmp.lt.s32.totalorder %s507_s5, %s500_s28 }
  0x24   : > { %p504_p1 = pneg %p503_p0  ;;  %p510_p11 = por %p509_p12, %p508_p3 }
  0x26   : > { %p511_p6 = pnand %p510_p11, %p504_p1 }
  0x28   : > { %514 = shalt.err (!%p511_p6)
}
  0x29   : > { %s582_s6 = smov 512   ;;  %s583_s9 = smov 256  }
  0x2a   : > { %s584_s12 = smov 16   ;;  %p181_p9 = scmp.lt.s32.totalorder %s579_s18, 3 }
  0x2b   : > { %442 = dma.hbm_to_vmem [thread:$0]  (!%p674_p13), %s672_s7, 1280, %s678_s10, %s681_s11, %s582_s6, %s583_s9, %s584_s12  }
  0x2c   : > { %p770_p0 = scmp.ge.s32.totalorder %s579_s18, 1 }
  0x2e   : > { %p182_p2 = pnand %p770_p0, %p181_p9 }
  0x2f   : > { %s706_s13 = sand.u32 (!%p182_p2), 1, %s571_s16   ;;  %p771_p6 = scmp.ne.s32.totalorder (!%p182_p2), %s766_s25, 0 }
  0x30   : > { %185 = sbr.rel (%p182_p2) target bundleno = 280 (0x118), region = 36  ;;  %s188_s20 = scalar_lea.sflag (!%p182_p2), [#allocation3], %s706_s13 }
  0x31   : > { %s434_s14 = smul.u32 (!%p182_p2), 80, %s706_s13 }
  0x33   : > { %s191_s22 = scalar_lea.vmem (!%p182_p2), [#allocation2], %s434_s14 }
  0x35   : > { %558 = dma.done.wait (%p771_p6), %s188_s20, 1280  }
  0x36   : > { %560 = vsyncadd (%p771_p6), %s188_s20, 4294966016  ;;  %v585_v0 = vmov 0.0   ;;  %v586_v1 = vmov 0   ;;  %vm233_vm0 = vcmask 1043456   ;;  %v228_v2 = vld [vmem:[%s191_s22 + $0x48] sm:$0xf] }
  0x37   : > { %304 = vmatprep.mubr.f32.mxu0 %v585_v0  ;;  %486 = vset.pattern.permute.xlu0 %v586_v1  ;;  %v227_v3 = vld [vmem:[%s191_s22 + $0x40] sm:$0xf]  ;;  %v226_v4 = vld [vmem:[%s191_s22 + $0x38] sm:$0xff]  ;;  %v225_v5 = vld [vmem:[%s191_s22 + $0x30] sm:$0xff]  ;;  %vm229_vm1 = vcmask 293888   ;;  %s422_s28 = sshll.u32 %s706_s13, 4 }
  0x38   : > { %423 = vmatprep.subr.msk.mxu0 %vm233_vm0, %v228_v2  ;;  %v224_v6 = vld [vmem:[%s191_s22 + $0x28] sm:$0xff]  ;;  %v223_v7 = vld [vmem:[%s191_s22 + $0x20] sm:$0xff]  ;;  %v222_v9 = vld [vmem:[%s191_s22 + $0x18] sm:$0xff]  ;;  %s432_s29 = sshll.u32 %s634_s19, 8  ;;  %s215_s30 = scalar_lea.vmem [#allocation5], %s422_s28 }
  0x39   : > { %424 = vmatpush1.msk.msra.mxu0 %vm233_vm0, %v227_v3  ;;  %v311_v8 = vld [vmem:[%s761_s2] sm:$0xff]  ;;  %v220_v12 = vld [vmem:[%s191_s22 + $0x8] sm:$0xff]  ;;  %s346_s5 = sshll.u32 %s215_s30, 4  ;;  %s344_s12 = scalar_lea.hbm %s763_s4, %s432_s29  ;;  %s347_s5 = int_to_ptr.vmem [resolvable:$true] %s346_s5 }
  0x3a   : > { %264 = vmatprep.subr.mxu0 %v226_v4  ;;  %314 = vperm.xlu0 %486, %v311_v8   ;;  %v221_v10 = vld [vmem:[%s191_s22 + $0x10] sm:$0xff]  ;;  %v219_v13 = vld [vmem:[%s191_s22] sm:$0xff]  ;;  %s332_s14 = scalar_lea.sflag [#allocation4], %s706_s13  ;;  %s515_s20 = scalar_lea.vmem %s347_s5, 256 }
  0x3b   : > { %265 = vmatpush1.msra.mxu0 %v225_v5  ;;  %v319_v11 = vld [vmem:[%s762_s3] sm:$0xff]  ;;  %p516_p11 = scmp.ne.s32.totalorder %s347_s5, %s515_s20  ;;  %p772_p12 = scmp.ne.s32.totalorder %s767_s26, 0 }
  0x3c   : > { %266 = vmatprep.subr.mxu0 %v224_v6  ;;  %v218_v14 = vld [vmem:[%s759_s0] sm:$0xff]  ;;  %s587_s22 = smov [#allocation5]  }
  0x3d   : > { %267 = vmatpush1.msra.mxu0 %v223_v7  ;;  %p517_p13 = pnand %p516_p11, %p772_p12  ;;  %s519_s19 = sshll.u32 %s587_s22, 4  ;;  %s520_s19 = int_to_ptr.vmem [resolvable:$false] %s519_s19 }
  0x3e   : > { %268 = vmatprep.subr.mxu0 %v222_v9  ;;  %322 = vperm.xlu0 %486, %v319_v11   ;;  %s521_s7 = scalar_lea.vmem %s520_s19, 512  ;;  %p522_p5 = scmp.lt.s32.totalorder %s347_s5, %s520_s19 }
  0x3f   : > { %269 = vmatpush1.msra.mxu0 %v221_v10  ;;  %p518_p4 = pneg %p517_p13  ;;  %p523_p7 = scmp.lt.s32.totalorder %s521_s7, %s515_s20 }
  0x40   : > { %270 = vmatprep.subr.mxu0 %v220_v12 }
  0x41   : > { %271 = vmatpush1.msra.mxu0 %v219_v13  ;;  %p524_p8 = por %p523_p7, %p522_p5 }
  0x42   : > { %425 = vmatmul.mubr.msk.f32.vlgmr.msra.gmra.mxu0 %vm229_vm1, %v218_v14 }
  0x43   : > { %p525_p10 = pnand %p524_p8, %p518_p4 }
  0xb5   : > { %v315_v15 = vpop.permute.xlu0 %314 }
  0xb9   : > { %v323_v18 = vpop.permute.xlu0 %322 }
 0x102   : > { %v306_v16 = vpop.f32.mrf.mxu0 }
 0x103   : > { %v317_v17 = vmul.f32 %v315_v15, %v306_v16 }
 0x104   : > { %v308_v19 = vpop.f32.mrf.mxu0 }
 0x105   : > { %v325_v20 = vadd.f32 %v323_v18, %v317_v17  ;;  %v318_v21 = vmul.f32 %v315_v15, %v308_v19 }
 0x107   : > { %v327_v22 = vmax.f32 %v325_v20, 0.0  ;;  %v326_v23 = vadd.f32 %v323_v18, %v318_v21 }
 0x109   : > { %329 = vst [vmem:[%s215_s30] sm:$0xff] %v327_v22  ;;  %v328_v24 = vmax.f32 %v326_v23, 0.0 }
 0x10b   : > { %330 = vst [vmem:[%s215_s30 + $0x8] sm:$0xff] %v328_v24 }
 0x10c   : > { %528 = shalt.err (!%p525_p10)
}
 0x10d   : > { %s529_s8 = scalar_lea.hbm %s344_s12, 256  ;;  %s533_s10 = scalar_lea.hbm %s763_s4, 512 }
 0x10e   : > { %p530_p1 = scmp.ne.s32.totalorder %s344_s12, %s529_s8  ;;  %p534_p0 = scmp.lt.s32.totalorder %s344_s12, %s763_s4 }
 0x10f   : > { %p535_p2 = scmp.lt.s32.totalorder %s533_s10, %s529_s8 }
 0x110   : > { %p531_p3 = pnand %p530_p1, %p772_p12 }
 0x111   : > { %p536_p6 = por %p535_p2, %p534_p0 }
 0x112   : > { %p532_p9 = pneg %p531_p3 }
 0x114   : > { %p537_p11 = pnand %p536_p6, %p532_p9 }
 0x116   : > { %540 = shalt.err (!%p537_p11)
}
 0x117   : > { %437 = dma.vmem_to_hbm [thread:$0]  (%p772_p12), %s347_s5, 256, %s344_s12, %s332_s14  }
 0x118 PF: > { %s358_s28 = sand.u32 1, %s567_s15   ;;  %p773_p13 = scmp.ne.s32.totalorder %s768_s27, 0 }
 0x119   : > { %p774_p4 = scmp.ge.s32.totalorder %s579_s18, 2  ;;  %s359_s29 = scalar_lea.sflag [#allocation4], %s358_s28 }
 0x11b   : > { %p444_p5 = pnand %p774_p4, %p773_p13 }
 0x11d   : > { %p445_p7 = pneg %p444_p5 }
 0x11f   : > { %562 = dma.done.wait (%p445_p7), %s359_s29, 256  }
 0x120   : > { %564 = vsyncadd (%p445_p7), %s359_s29, 4294967040  ;;  %p17_p8 = scmp.ge.s32.totalorder %s638_s21, 4   ;;  %s775_s15 = smov %s571_s16 }
 0x121   : > { %s776_s16 = smov %s575_s17  ;;  %s777_s17 = smov %s650_s24 }
 0x122   : > { %s778_s18 = smov %s638_s21  ;;  %19 = sbr.rel (!%p17_p8) target bundleno = 5 (0x5), region = 81 }
 0x127   :  { %364 = vsyncpa [#allocation3], 1 }
 0x128   :  { %366 = vsyncpa [#allocation3 + $0x1], 1 }
 0x129   :  { %367 = vsyncpa [#allocation4], 1 }
 0x12a   :  { %369 = vsyncpa [#allocation4 + $0x1], 1 }

</bundles_post_ra>
